<compile_context>
chip_gen: v5e
topology: v5e:2x2
jax: 0.10.0
libtpu: 0.0.40
codegen_flags: <defaults>
</compile_context>

<pallas_src>
import functools

import jax
import jax.numpy as jnp
from jax.experimental import pallas as pl
from jax.experimental.pallas import tpu as pltpu


def _round_up(x, m):
    return ((x + m - 1) // m) * m


def _global_avg_pool_kernel(x_ref, o_ref, acc_ref, *, hw_total, tk):
    # x_ref:   (TR, TK) input tile in VMEM
    # o_ref:   (TR, 1)  output tile (written only on the last reduction step)
    # acc_ref: (TR, 1)  f32 accumulator, persistent across the hw-reduction axis
    k = pl.program_id(1)

    @pl.when(k == 0)
    def _():
        acc_ref[...] = jnp.zeros_like(acc_ref)

    x = x_ref[...].astype(jnp.float32)
    if hw_total % tk != 0:
        # Ragged last hw block: mask out padded / out-of-bounds lanes so
        # garbage never enters the sum.
        valid = hw_total - k * tk
        lane = jax.lax.broadcasted_iota(jnp.int32, x.shape, dimension=1)
        x = jnp.where(lane < valid, x, 0.0)

    # XLU cross-lane reduce — sits in a different VLIW slot than the loads,
    # so it is fully hidden behind the HBM stream (do NOT use an MXU dot).
    acc_ref[...] += jnp.sum(x, axis=-1, keepdims=True)

    @pl.when(k == pl.num_programs(1) - 1)
    def _():
        # Divide by the true H*W, never the (possibly padded) tile width.
        o_ref[...] = (acc_ref[...] * (1.0 / hw_total)).astype(o_ref.dtype)


def _choose_tiles(rows, hw, itemsize):
    """Pick (row_tile, hw_tile) so each input block is ~2 MiB."""
    # Minimum sublane tile: 8 for 4-byte, 16 for 2-byte, 32 for 1-byte dtypes.
    sublane = max(8, 32 // itemsize)
    target_bytes = 2 * 1024 * 1024  # per block; Pallas double-buffers => ~4 MiB live

    hw_padded = _round_up(hw, 128)
    row_bytes = hw_padded * itemsize

    if row_bytes * sublane <= target_bytes:
        # A full spatial row is cheap: tile rows only (single reduction step).
        tk = hw
        tr = (target_bytes // row_bytes) // sublane * sublane
        tr = max(tr, sublane)
    else:
        # Very large H*W: add a real hw-reduction axis with lane-aligned tiles.
        tr = sublane * 8
        tk = (target_bytes // (tr * itemsize)) // 128 * 128
        tk = max(tk, 128)
        if tk >= hw:
            tk = hw

    if tr >= rows:
        tr = rows  # full-extent block; no multiple-of-sublane requirement
    return tr, tk


def global_pooling_block(x):
    """Pallas equivalent of GlobalPoolingBlock.forward: AdaptiveAvgPool2d(1) on NCHW."""
    n, c, h, w = x.shape
    rows = n * c
    hw = h * w
    x2d = x.reshape(rows, hw)

    itemsize = jnp.dtype(x.dtype).itemsize
    tr, tk = _choose_tiles(rows, hw, itemsize)
    grid = (pl.cdiv(rows, tr), pl.cdiv(hw, tk))

    # Explicit VMEM budget: 2x (double-buffered) input block + output +
    # accumulator + slack; capped at v7x's 64 MiB physical VMEM.
    block_bytes = tr * _round_up(tk, 128) * itemsize
    vmem_limit = min(max(4 * block_bytes + (4 << 20), 32 << 20), 64 << 20)

    kernel = functools.partial(_global_avg_pool_kernel, hw_total=hw, tk=tk)

    out2d = pl.pallas_call(
        kernel,
        out_shape=jax.ShapeDtypeStruct((rows, 1), x.dtype),
        grid_spec=pltpu.PrefetchScalarGridSpec(
            num_scalar_prefetch=0,
            grid=grid,
            in_specs=[pl.BlockSpec((tr, tk), lambda i, k: (i, k))],
            out_specs=pl.BlockSpec((tr, 1), lambda i, k: (i, 0)),
            scratch_shapes=[pltpu.VMEM((tr, 1), jnp.float32)],
        ),
        compiler_params=pltpu.CompilerParams(
            # Row tiles are independent -> "parallel" (sharded across the two
            # TensorCores on v7x); the hw-reduction axis must stay "arbitrary".
            dimension_semantics=("parallel", "arbitrary"),
            vmem_limit_bytes=vmem_limit,
        ),
    )(x2d)

    return out2d.reshape(n, c, 1, 1)


if __name__ == "__main__":
    key = jax.random.PRNGKey(0)
    # Small shapes consistent with the module: batch=2, channels=4, spatial=16
    x = jax.random.normal(key, (2, 4, 16, 16), dtype=jnp.float32)

    out = global_pooling_block(x)
    out = jax.block_until_ready(out)

    # Reference check against plain JAX mean over spatial dims
    ref = jnp.mean(x, axis=(2, 3), keepdims=True)
    assert out.shape == (2, 4, 1, 1), f"bad shape {out.shape}"
    assert jnp.allclose(out, ref, atol=1e-6, rtol=1e-6), "mismatch vs reference"

    print("KERNEL_OK")
</pallas_src>

<mosaic_0001>
module attributes {stable_mosaic.version = 11 : i64} {
  func.func @_global_avg_pool_kernel(%arg0: i32, %arg1: i32, %arg2: memref<8x256xf32, #tpu.memory_space<vmem>>, %arg3: memref<8x1xf32, #tpu.memory_space<vmem>>, %arg4: memref<8x1xf32, #tpu.memory_space<vmem>>) attributes {dimension_semantics = [#tpu.dimension_semantics<parallel>, #tpu.dimension_semantics<arbitrary>], iteration_bounds = array<i64: 1, 1>, scalar_prefetch = 0 : i64, scratch_operands = 1 : i64, tpu.core_type = #tpu.core_type<tc>, window_params = [{transform_indices = @transform_0, window_bounds = array<i64: 8, 256>}, {transform_indices = @transform_1, window_bounds = array<i64: 8, 1>}]} {
    %c0_i32 = arith.constant 0 : i32
    %0 = arith.cmpi eq, %arg1, %c0_i32 : i32
    %1 = arith.extui %0 : i1 to i32
    %c0_i32_0 = arith.constant 0 : i32
    %2 = arith.cmpi ne, %1, %c0_i32_0 : i32
    scf.if %2 {
      %cst_8 = arith.constant 0.000000e+00 : f32
      %12 = vector.broadcast %cst_8 : f32 to vector<8x1xf32>
      %c0_9 = arith.constant 0 : index
      %c0_10 = arith.constant 0 : index
      %13 = vector.load %arg4[%c0_9, %c0_10] : memref<8x1xf32, #tpu.memory_space<vmem>>, vector<8x1xf32>
      tpu.vector_store %arg4[%c0_9, %c0_10], %12 {strides = array<i32>} : memref<8x1xf32, #tpu.memory_space<vmem>>, vector<8x1xf32>,
    } else {
    }
    %c0 = arith.constant 0 : index
    %c0_1 = arith.constant 0 : index
    %3 = vector.load %arg2[%c0, %c0_1] : memref<8x256xf32, #tpu.memory_space<vmem>>, vector<8x256xf32>
    %c0_2 = arith.constant 0 : index
    %c0_3 = arith.constant 0 : index
    %4 = vector.load %arg4[%c0_2, %c0_3] : memref<8x1xf32, #tpu.memory_space<vmem>>, vector<8x1xf32>
    %cst = arith.constant dense<0.000000e+00> : vector<8xf32>
    %5 = vector.multi_reduction <add>, %3, %cst [1] : vector<8x256xf32> to vector<8xf32>
    %6 = vector.shape_cast %5 : vector<8xf32> to vector<8x1xf32>
    %7 = arith.addf %4, %6 : vector<8x1xf32>
    %c0_4 = arith.constant 0 : index
    %c0_5 = arith.constant 0 : index
    %8 = vector.load %arg4[%c0_4, %c0_5] : memref<8x1xf32, #tpu.memory_space<vmem>>, vector<8x1xf32>
    tpu.vector_store %arg4[%c0_4, %c0_5], %7 {strides = array<i32>} : memref<8x1xf32, #tpu.memory_space<vmem>>, vector<8x1xf32>,
    %c0_i32_6 = arith.constant 0 : i32
    %9 = arith.cmpi eq, %arg1, %c0_i32_6 : i32
    %10 = arith.extui %9 : i1 to i32
    %c0_i32_7 = arith.constant 0 : i32
    %11 = arith.cmpi ne, %10, %c0_i32_7 : i32
    scf.if %11 {
      %c0_8 = arith.constant 0 : index
      %c0_9 = arith.constant 0 : index
      %12 = vector.load %arg4[%c0_8, %c0_9] : memref<8x1xf32, #tpu.memory_space<vmem>>, vector<8x1xf32>
      %cst_10 = arith.constant 3.906250e-03 : f32
      %13 = vector.broadcast %cst_10 : f32 to vector<8x1xf32>
      %14 = arith.mulf %12, %13 : vector<8x1xf32>
      %c0_11 = arith.constant 0 : index
      %c0_12 = arith.constant 0 : index
      %15 = vector.load %arg3[%c0_11, %c0_12] : memref<8x1xf32, #tpu.memory_space<vmem>>, vector<8x1xf32>
      tpu.vector_store %arg3[%c0_11, %c0_12], %14 {strides = array<i32>} : memref<8x1xf32, #tpu.memory_space<vmem>>, vector<8x1xf32>,
    } else {
    }
    return
  }
  func.func @transform_0(%arg0: i32, %arg1: i32) -> (i32, i32) {
    %c0_i32 = arith.constant 0 : i32
    return %arg0, %arg1 : i32, i32
  }
  func.func @transform_1(%arg0: i32, %arg1: i32) -> (i32, i32) {
    %c0_i32 = arith.constant 0 : i32
    %c0_i32_0 = arith.constant 0 : i32
    return %arg0, %c0_i32 : i32, i32
  }
}

</mosaic_0001>

<bundles_post_ra>
// kernel: tpu_custom_call.1
= control target key start
LH: loop header
LB: loop body
LE: loop exit
PB: predicated region body
PF: predicated region fallthrough
CT: control target
= control target key end

     0   :  { %6 = vsyncpa [#allocation4], 0  ;;  %s76_s9 = smov [#allocation3]   ;;  %s94_s0 = inlined_call_operand.hbm [shape: f32[8,256], index: 0, kind: input, shape index: {}]   ;;  %s95_s1 = inlined_call_operand.vmem [shape: f32[8,1], index: 1, kind: output, shape index: {}]  }
   0x1   :  { %s12_s8 = sshll.u32 %s94_s0, 4  ;;  %s14_s10 = sshll.u32 %s76_s9, 4  ;;  %s13_s8 = int_to_ptr.hbm [resolvable:$true] %s12_s8  ;;  %s15_s10 = int_to_ptr.vmem [resolvable:$true] %s14_s10 }
   0x2   :  { %17 = dma.hbm_to_vmem [thread:$0]  %s13_s8, 256, %s15_s10, [#allocation4]  }
   0x3   :  { %74 = dma.done.wait [#allocation4], 256  }
   0x4   :  { %75 = vsyncadd [#allocation4], 4294967040  ;;  %vm26_vm0 = vcmask 7168   ;;  %v77_v0 = vmov 0.0   ;;  %v28_v1 = vld [vmem:[#allocation3] sm:$0xff]  ;;  %v29_v2 = vld [vmem:[#allocation3 + $0x8] sm:$0xff] }
   0x5   :  { %27 = vst.msk [vmem:[#allocation2] sm:$0xff] %vm26_vm0, %v77_v0  ;;  %v31_v3 = vadd.f32 %v29_v2, %v28_v1 }
   0x7   :  { %32 = vadd.xlane.f32.xlu0 %v31_v3 }
   0xc   :  { %v30_v4 = vld [vmem:[#allocation2] sm:$0xff] }
  0x7a   :  { %v33_v5 = vpop.xlane.xlu0 %32 }
  0x7b   :  { %v34_v6 = vadd.f32 %v33_v5, %v30_v4 }
  0x7d   :  { %36 = vst.msk [vmem:[#allocation2] sm:$0xff] %vm26_vm0, %v34_v6 }
  0x84   :  { %v40_v7 = vld [vmem:[#allocation2] sm:$0xff] }
  0x85   :  { %v41_v8 = vmul.f32 0.00390625, %v40_v7 }
  0x87   :  { %42 = vst.msk [vmem:[%s95_s1] sm:$0xff] %vm26_vm0, %v41_v8 }
  0x88   :  { %47 = vsyncpa [#allocation4], 1 }

</bundles_post_ra>
